<compile_context>
chip_gen: v7x
topology: tpu7x:2x2x1
jax: 0.10.0
libtpu: 0.0.40
codegen_flags: <defaults>
</compile_context>

<pallas_src>
import functools
import math

import jax
import jax.numpy as jnp
from jax.experimental import pallas as pl
from jax.experimental.pallas import tpu as pltpu

_HALF_LOG_2PI = 0.5 * math.log(2.0 * math.pi)


def _round_up(x, m):
    return ((x + m - 1) // m) * m


def _num_tensorcores():
    """Best-effort TensorCores-per-chip query (1 on any failure: safe default).

    Used only to decide whether forcing a multi-tile split is worthwhile: on a
    multi-TC part (v7x) the parallel grid axis is the only path to the 2nd
    TensorCore, while on single-core parts (v5e/v6e) a forced split is pure
    per-step overhead.
    """
    try:
        info = pltpu.get_tpu_info()
        for name in ("num_cores", "core_count", "tensorcore_count",
                     "num_tensorcores"):
            val = getattr(info, name, None)
            if isinstance(val, int) and val > 0:
                return val
        if "7" in str(getattr(info, "chip_version", "")):
            return 2
    except Exception:
        pass
    try:
        kind = jax.devices()[0].device_kind.lower()
        if "v7" in kind or "tpu7" in kind:
            return 2
    except Exception:
        pass
    return 1


def _shift_poly_coeffs(shift):
    """Coefficients (highest-degree first) of prod(x)=prod_{j<K}(x+j) and prod'(x).

    sum_{j<K} 1/(x+j) == prod'(x)/prod(x): the K exact divides of the naive
    shift recurrence collapse to Horner (VPU) + one reciprocal (EUP).
    All coefficients are small positive integers -> no cancellation.
    """
    c = [1.0]                                   # lowest-degree first
    for j in range(shift):
        nxt = [0.0] * (len(c) + 1)
        for i, ci in enumerate(c):
            nxt[i + 1] += ci
            nxt[i] += ci * float(j)
        c = nxt
    deriv = [c[i] * float(i) for i in range(1, len(c))]
    return tuple(reversed(c)), tuple(reversed(deriv))


def _horner(coeffs, x):
    acc = jnp.full_like(x, coeffs[0])
    for c in coeffs[1:]:
        acc = acc * x + c
    return acc


def _refined_reciprocal(x, newton_steps=2):
    # One EUP approximate reciprocal + Newton steps on the VPU (VALU has slack
    # in this EUP-bound kernel) -> full f32 accuracy at 1 EUP op.
    r = pl.reciprocal(x, approx=True)
    for _ in range(newton_steps):
        r = r * (2.0 - x * r)
    return r


def _lgamma_digamma(x, shift, coeffs):
    """Fused lgamma + digamma via shift-by-K + shared Stirling tails.

    Requires x > 0 and x + shift >= 5.  EUP ops per element: 2 logs +
    2 reciprocals (K > 0), down from ~K+3 in v2.
    """
    if shift > 0:
        prod_c, deriv_c = coeffs
        z = x + float(shift)
        prod = _horner(prod_c, x)               # prod_{j<K}(x+j)
        pnum = _horner(deriv_c, x)              # d/dx prod
    else:
        z = x

    logz = jnp.log(z)
    inv = _refined_reciprocal(z)
    inv2 = inv * inv

    lg = ((z - 0.5) * logz - z + _HALF_LOG_2PI
          + inv * (1.0 / 12.0 - inv2 * (1.0 / 360.0 - inv2 * (1.0 / 1260.0))))
    dg = (logz - 0.5 * inv
          - inv2 * (1.0 / 12.0 - inv2 * (1.0 / 120.0 - inv2 * (1.0 / 252.0))))

    if shift > 0:
        lg = lg - jnp.log(prod)
        dg = dg - pnum * _refined_reciprocal(prod)
    return lg, dg


# ----------------------------------------------------------------------------
# Kernel: one independent row tile per grid step (grid axis is "parallel").
# Input is lane-packed alpha; padded samples are masked out exactly in-kernel.
# Outputs are two lane-dense per-tile partial-sum slabs.
# ----------------------------------------------------------------------------
def _edl_kl_kernel(alpha_ref, slot_ref, gmat_ref, cw_ref, sr_ref, *,
                   n_valid, s_per_row, shift_alpha, shift_sum,
                   alpha_coeffs, sum_coeffs):
    alpha = alpha_ref[...]                                   # (TR, W) f32
    tr, w = alpha.shape

    # Exact validity mask: padded samples contribute exactly 0 to every sum,
    # so the epilogue needs no analytic padding corrections.
    row_ids = jax.lax.broadcasted_iota(jnp.int32, (tr, w), 0)
    sample_id = (pl.program_id(0) * tr + row_ids) * s_per_row + slot_ref[...]
    valid = sample_id < n_valid                              # (TR, W)

    # Heavy transcendental work, lane-dense.
    lg_a, dg_a = _lgamma_digamma(alpha, shift_alpha, alpha_coeffs)
    am1 = alpha - 1.0

    main_row = jnp.sum(jnp.where(valid, am1 * dg_a - lg_a, 0.0),
                       axis=0, keepdims=True)                # (1, W)
    e_row = jnp.sum(jnp.where(valid, am1, 0.0), axis=0, keepdims=True)
    cw_ref[:, 0:1, :] = main_row[None]
    cw_ref[:, 1:2, :] = e_row[None]

    # Per-sample sum_alpha, lane-dense as (S, TR) via the grouping matmul on
    # the otherwise-idle MXU.  Keep it f32 (review): accuracy matters, MXU is
    # not the binding slot.
    s_alpha = jax.lax.dot_general(
        gmat_ref[...], alpha,
        dimension_numbers=(((1,), (1,)), ((), ())),
        preferred_element_type=jnp.float32)                  # (S, TR)
    lg_s, dg_s = _lgamma_digamma(s_alpha, shift_sum, sum_coeffs)

    col_ids = jax.lax.broadcasted_iota(jnp.int32, (s_per_row, tr), 1)
    s_ids = jax.lax.broadcasted_iota(jnp.int32, (s_per_row, tr), 0)
    valid_s = ((pl.program_id(0) * tr + col_ids) * s_per_row + s_ids) < n_valid
    sr_ref[:, 0:1, :] = jnp.sum(jnp.where(valid_s, lg_s, 0.0),
                                axis=0, keepdims=True)[None]
    sr_ref[:, 1:2, :] = jnp.sum(jnp.where(valid_s, dg_s, 0.0),
                                axis=0, keepdims=True)[None]


# ----------------------------------------------------------------------------
# Wrapper: one-hot fold, pack, pad, tile, call the kernel, combine partials.
# ----------------------------------------------------------------------------
def edl_kldiv_loss(evidence, label, *, lamb=1.0, loss_weight=1.0,
                   step=500, max_steps=1000, tile_rows=2048):
    """EDL KL-divergence regularizer (forward pass of EDLKLDivLoss).

    Assumes non-negative evidence and lamb > 0 (same positivity requirement as
    the reference: lgamma/digamma need alpha > 0).
    """
    # TODO(synk): get_curr_iter_info() is a framework training-loop global;
    # (step, max_steps) are taken as explicit arguments instead.
    if float(lamb) <= 0.0:
        raise ValueError("edl_kldiv_loss requires lamb > 0 (alpha must stay positive).")
    num_classes = int(evidence.shape[-1])
    assert num_classes >= 2
    ev = evidence.reshape(-1, num_classes).astype(jnp.float32)
    lab = label.reshape(-1).astype(jnp.int32)
    n_valid = int(ev.shape[0])

    # One-hot replacement of the true-class alpha folded into the wrapper's
    # elementwise/pad/reshape chain (review: removes the int32 label stream —
    # ~50% of input bytes — and the in-kernel compare/select).
    one_hot = lab[:, None] == jnp.arange(num_classes, dtype=jnp.int32)[None, :]
    alpha = jnp.where(one_hot, 1.0, ev + float(lamb))        # alpha == 1 exactly at true class

    # ---- lane-dense packing: S samples per (<=128)-lane row ----
    s_per_row = max(1, 128 // num_classes)
    w = s_per_row * num_classes

    # ---- tiling ----
    r_raw = -(-n_valid // s_per_row)
    r_aligned = _round_up(max(r_raw, 1), 8)
    tr_cap = max(8, _round_up(int(tile_rows), 8))
    n_tiles = max(1, -(-r_aligned // tr_cap))
    n_cores = _num_tensorcores()
    if n_cores > 1 and r_aligned >= 8 * n_cores:
        # v7x: give every TensorCore at least one tile (multiple of core count)
        # and split real rows evenly so no core gets a padding-heavy tile.
        n_tiles = _round_up(max(n_tiles, n_cores), n_cores)
    tr = _round_up(-(-r_aligned // n_tiles), 8)
    r_pad = tr * n_tiles
    n_pad = r_pad * s_per_row - n_valid
    # VMEM note: per-tile working set ~= 2*TR*W*4 B (double-buffered input) +
    # a handful of (TR, W) f32 temporaries -> ~10 MiB at TR=2048, under v5e's
    # 16 MiB default scoped VMEM and far under v7x's 64 MiB physical VMEM.
    # If tile_rows is raised, set pltpu.CompilerParams(vmem_limit_bytes=...)
    # and re-budget against the v7x ceiling.

    # Padded samples get alpha == 1 (finite transcendentals); they are masked
    # out exactly inside the kernel, so padding never changes the loss.
    alpha_p = jnp.pad(alpha, ((0, n_pad), (0, 0)), constant_values=1.0)
    alpha_packed = alpha_p.reshape(r_pad, w)

    slot = jnp.repeat(jnp.arange(s_per_row, dtype=jnp.int32), num_classes)
    lane_slot = slot.reshape(1, w)                           # (1, W) int32, tiny
    gmat = (slot[None, :] ==
            jnp.arange(s_per_row, dtype=jnp.int32)[:, None]).astype(jnp.float32)

    # Shifts so the Stirling tails are evaluated at z >= 5.
    min_alpha = min(1.0, float(lamb))
    min_sum = min(float(num_classes), 1.0 + (num_classes - 1) * float(lamb))
    shift_alpha = max(0, int(math.ceil(5.0 - min_alpha)))
    shift_sum = max(0, int(math.ceil(5.0 - min_sum)))

    kernel = functools.partial(
        _edl_kl_kernel, n_valid=n_valid, s_per_row=s_per_row,
        shift_alpha=shift_alpha, shift_sum=shift_sum,
        alpha_coeffs=_shift_poly_coeffs(shift_alpha),
        sum_coeffs=_shift_poly_coeffs(shift_sum))

    out_shapes = (
        # row 0: sum_c[(a-1)psi(a) - lnG(a)], row 1: sum_c (a-1)
        jax.ShapeDtypeStruct((n_tiles, 2, w), jnp.float32),
        # row 0: lnG(sum_alpha), row 1: psi(sum_alpha)
        jax.ShapeDtypeStruct((n_tiles, 2, tr), jnp.float32),
    )
    out_specs = (
        pl.BlockSpec((1, 2, w), lambda i: (i, 0, 0)),
        pl.BlockSpec((1, 2, tr), lambda i: (i, 0, 0)),
    )

    cw, sr = pl.pallas_call(
        kernel,
        out_shape=out_shapes,
        grid_spec=pltpu.PrefetchScalarGridSpec(
            num_scalar_prefetch=0,
            grid=(n_tiles,),
            in_specs=[
                pl.BlockSpec((tr, w), lambda i: (i, 0)),
                pl.BlockSpec((1, w), lambda i: (0, 0)),
                pl.BlockSpec((s_per_row, w), lambda i: (0, 0)),
            ],
            out_specs=out_specs,
        ),
        compiler_params=pltpu.CompilerParams(
            dimension_semantics=("parallel",),   # independent tiles -> both TCs on v7x
        ),
    )(alpha_packed, lane_slot, gmat)

    sum_main = jnp.sum(cw[:, 0, :])
    sum_e = jnp.sum(cw[:, 1, :])
    sum_lgs = jnp.sum(sr[:, 0, :])
    sum_dgs = jnp.sum(sr[:, 1, :])

    # Factorized mean of the reference's (N, N, C) broadcast: A/N - D*E/N^2.
    n = float(n_valid)
    a_sum = sum_lgs + sum_main - n * math.lgamma(float(num_classes))
    mean_kl = a_sum / n - (sum_dgs * sum_e) / (n * n)

    kl_weight = min(1.0, float(step) / float(max_steps))
    return (float(loss_weight) * kl_weight) * mean_kl


def _edl_kldiv_reference(evidence, label, *, lamb, loss_weight, step, max_steps):
    """Direct JAX port of the PyTorch reference, incl. its (N, N, C) broadcast."""
    from jax.scipy.special import digamma, gammaln
    num_classes = evidence.shape[-1]
    y = jax.nn.one_hot(label, num_classes, dtype=evidence.dtype)
    alpha = y + (1.0 - y) * (evidence + lamb)
    sum_alpha = alpha.sum(-1, keepdims=True)
    t1 = gammaln(sum_alpha) - gammaln(jnp.full_like(sum_alpha, num_classes))
    t2 = gammaln(alpha).sum(-1, keepdims=True)
    t3 = alpha - 1.0
    t4 = digamma(alpha) - digamma(sum_alpha)[..., None]      # (N, N, C) broadcast
    kl = t1 - t2 + (t3 * t4).sum(-1, keepdims=True)
    kl_weight = min(1.0, float(step) / float(max_steps))
    return loss_weight * kl_weight * kl.mean()


if __name__ == "__main__":
    key = jax.random.PRNGKey(0)
    k1, k2 = jax.random.split(key)

    # The reference's broadcast only supports 2-D (N, C) evidence.
    N, C = 256, 8
    evidence = jax.nn.softplus(jax.random.normal(k1, (N, C), jnp.float32))
    label = jax.random.randint(k2, (N,), 0, C)

    loss_fn = jax.jit(functools.partial(
        edl_kldiv_loss, lamb=1.0, loss_weight=1.0, step=500, max_steps=1000))
    loss = loss_fn(evidence, label)
    jax.block_until_ready(loss)

    ref = _edl_kldiv_reference(evidence, label, lamb=1.0, loss_weight=1.0,
                               step=500, max_steps=1000)
    ref = float(jax.block_until_ready(ref))
    got = float(loss)
    if (not math.isfinite(got)) or abs(got - ref) > 5e-3 * max(1.0, abs(ref)):
        raise SystemExit(f"mismatch: kernel={got!r} reference={ref!r}")
    print("KERNEL_OK")
</pallas_src>

<mosaic_0001>
module attributes {stable_mosaic.version = 11 : i64} {
  func.func @_edl_kl_kernel(%arg0: i32, %arg1: memref<16x128xf32, #tpu.memory_space<vmem>>, %arg2: memref<1x128xi32, #tpu.memory_space<vmem>>, %arg3: memref<16x128xf32, #tpu.memory_space<vmem>>, %arg4: memref<1x2x128xf32, #tpu.memory_space<vmem>>, %arg5: memref<1x2x16xf32, #tpu.memory_space<vmem>>) attributes {dimension_semantics = [#tpu.dimension_semantics<parallel>], iteration_bounds = array<i64: 1>, scalar_prefetch = 0 : i64, scratch_operands = 0 : i64, tpu.core_type = #tpu.core_type<tc>, window_params = [{transform_indices = @transform_0, window_bounds = array<i64: 16, 128>}, {pipeline_mode = #tpu.pipeline_mode<synchronous>, transform_indices = @transform_1, window_bounds = array<i64: 1, 128>}, {pipeline_mode = #tpu.pipeline_mode<synchronous>, transform_indices = @transform_2, window_bounds = array<i64: 16, 128>}, {transform_indices = @transform_3, window_bounds = array<i64: 1, 2, 128>}, {transform_indices = @transform_4, window_bounds = array<i64: 1, 2, 16>}]} {
    %c0 = arith.constant 0 : index
    %c0_0 = arith.constant 0 : index
    %0 = vector.load %arg1[%c0, %c0_0] : memref<16x128xf32, #tpu.memory_space<vmem>>, vector<16x128xf32>
    %1 = tpu.iota {dimensions = array<i32: 0>} : vector<16x128xi32>
    %c16_i32 = arith.constant 16 : i32
    %2 = arith.muli %arg0, %c16_i32 : i32
    %3 = vector.broadcast %2 : i32 to vector<16x128xi32>
    %4 = arith.addi %3, %1 : vector<16x128xi32>
    %c16_i32_1 = arith.constant 16 : i32
    %5 = vector.broadcast %c16_i32_1 : i32 to vector<16x128xi32>
    %6 = arith.muli %4, %5 : vector<16x128xi32>
    %c0_2 = arith.constant 0 : index
    %c0_3 = arith.constant 0 : index
    %7 = vector.load %arg2[%c0_2, %c0_3] : memref<1x128xi32, #tpu.memory_space<vmem>>, vector<1x128xi32>
    %8 = vector.broadcast %7 : vector<1x128xi32> to vector<16x128xi32>
    %9 = arith.addi %6, %8 : vector<16x128xi32>
    %c256_i32 = arith.constant 256 : i32
    %10 = vector.broadcast %c256_i32 : i32 to vector<16x128xi32>
    %11 = arith.cmpi slt, %9, %10 : vector<16x128xi32>
    %cst = arith.constant 4.000000e+00 : f32
    %12 = vector.broadcast %cst : f32 to vector<16x128xf32>
    %13 = arith.addf %0, %12 : vector<16x128xf32>
    %cst_4 = arith.constant 1.000000e+00 : f32
    %14 = vector.broadcast %cst_4 : f32 to vector<16x128xf32>
    %15 = arith.mulf %14, %0 : vector<16x128xf32>
    %cst_5 = arith.constant 6.000000e+00 : f32
    %16 = vector.broadcast %cst_5 : f32 to vector<16x128xf32>
    %17 = arith.addf %15, %16 : vector<16x128xf32>
    %18 = arith.mulf %17, %0 : vector<16x128xf32>
    %cst_6 = arith.constant 1.100000e+01 : f32
    %19 = vector.broadcast %cst_6 : f32 to vector<16x128xf32>
    %20 = arith.addf %18, %19 : vector<16x128xf32>
    %21 = arith.mulf %20, %0 : vector<16x128xf32>
    %cst_7 = arith.constant 6.000000e+00 : f32
    %22 = vector.broadcast %cst_7 : f32 to vector<16x128xf32>
    %23 = arith.addf %21, %22 : vector<16x128xf32>
    %24 = arith.mulf %23, %0 : vector<16x128xf32>
    %cst_8 = arith.constant 0.000000e+00 : f32
    %25 = vector.broadcast %cst_8 : f32 to vector<16x128xf32>
    %26 = arith.addf %24, %25 : vector<16x128xf32>
    %cst_9 = arith.constant 4.000000e+00 : f32
    %27 = vector.broadcast %cst_9 : f32 to vector<16x128xf32>
    %28 = arith.mulf %27, %0 : vector<16x128xf32>
    %cst_10 = arith.constant 1.800000e+01 : f32
    %29 = vector.broadcast %cst_10 : f32 to vector<16x128xf32>
    %30 = arith.addf %28, %29 : vector<16x128xf32>
    %31 = arith.mulf %30, %0 : vector<16x128xf32>
    %cst_11 = arith.constant 2.200000e+01 : f32
    %32 = vector.broadcast %cst_11 : f32 to vector<16x128xf32>
    %33 = arith.addf %31, %32 : vector<16x128xf32>
    %34 = arith.mulf %33, %0 : vector<16x128xf32>
    %cst_12 = arith.constant 6.000000e+00 : f32
    %35 = vector.broadcast %cst_12 : f32 to vector<16x128xf32>
    %36 = arith.addf %34, %35 : vector<16x128xf32>
    %37 = math.log %13 : vector<16x128xf32>
    %38 = tpu.reciprocal %13 {approx = true} : vector<16x128xf32> -> vector<16x128xf32>
    %39 = arith.mulf %13, %38 : vector<16x128xf32>
    %cst_13 = arith.constant 2.000000e+00 : f32
    %40 = vector.broadcast %cst_13 : f32 to vector<16x128xf32>
    %41 = arith.subf %40, %39 : vector<16x128xf32>
    %42 = arith.mulf %38, %41 : vector<16x128xf32>
    %43 = arith.mulf %13, %42 : vector<16x128xf32>
    %cst_14 = arith.constant 2.000000e+00 : f32
    %44 = vector.broadcast %cst_14 : f32 to vector<16x128xf32>
    %45 = arith.subf %44, %43 : vector<16x128xf32>
    %46 = arith.mulf %42, %45 : vector<16x128xf32>
    %47 = arith.mulf %46, %46 : vector<16x128xf32>
    %cst_15 = arith.constant 5.000000e-01 : f32
    %48 = vector.broadcast %cst_15 : f32 to vector<16x128xf32>
    %49 = arith.subf %13, %48 : vector<16x128xf32>
    %50 = arith.mulf %49, %37 : vector<16x128xf32>
    %51 = arith.subf %50, %13 : vector<16x128xf32>
    %cst_16 = arith.constant 0.918938517 : f32
    %52 = vector.broadcast %cst_16 : f32 to vector<16x128xf32>
    %53 = arith.addf %51, %52 : vector<16x128xf32>
    %cst_17 = arith.constant 7.93650805E-4 : f32
    %54 = vector.broadcast %cst_17 : f32 to vector<16x128xf32>
    %55 = arith.mulf %47, %54 : vector<16x128xf32>
    %cst_18 = arith.constant 0.00277777785 : f32
    %56 = vector.broadcast %cst_18 : f32 to vector<16x128xf32>
    %57 = arith.subf %56, %55 : vector<16x128xf32>
    %58 = arith.mulf %47, %57 : vector<16x128xf32>
    %cst_19 = arith.constant 0.0833333358 : f32
    %59 = vector.broadcast %cst_19 : f32 to vector<16x128xf32>
    %60 = arith.subf %59, %58 : vector<16x128xf32>
    %61 = arith.mulf %46, %60 : vector<16x128xf32>
    %62 = arith.addf %53, %61 : vector<16x128xf32>
    %cst_20 = arith.constant 5.000000e-01 : f32
    %63 = vector.broadcast %cst_20 : f32 to vector<16x128xf32>
    %64 = arith.mulf %63, %46 : vector<16x128xf32>
    %65 = arith.subf %37, %64 : vector<16x128xf32>
    %cst_21 = arith.constant 0.0039682542 : f32
    %66 = vector.broadcast %cst_21 : f32 to vector<16x128xf32>
    %67 = arith.mulf %47, %66 : vector<16x128xf32>
    %cst_22 = arith.constant 0.00833333377 : f32
    %68 = vector.broadcast %cst_22 : f32 to vector<16x128xf32>
    %69 = arith.subf %68, %67 : vector<16x128xf32>
    %70 = arith.mulf %47, %69 : vector<16x128xf32>
    %cst_23 = arith.constant 0.0833333358 : f32
    %71 = vector.broadcast %cst_23 : f32 to vector<16x128xf32>
    %72 = arith.subf %71, %70 : vector<16x128xf32>
    %73 = arith.mulf %47, %72 : vector<16x128xf32>
    %74 = arith.subf %65, %73 : vector<16x128xf32>
    %75 = math.log %26 : vector<16x128xf32>
    %76 = arith.subf %62, %75 : vector<16x128xf32>
    %77 = tpu.reciprocal %26 {approx = true} : vector<16x128xf32> -> vector<16x128xf32>
    %78 = arith.mulf %26, %77 : vector<16x128xf32>
    %cst_24 = arith.constant 2.000000e+00 : f32
    %79 = vector.broadcast %cst_24 : f32 to vector<16x128xf32>
    %80 = arith.subf %79, %78 : vector<16x128xf32>
    %81 = arith.mulf %77, %80 : vector<16x128xf32>
    %82 = arith.mulf %26, %81 : vector<16x128xf32>
    %cst_25 = arith.constant 2.000000e+00 : f32
    %83 = vector.broadcast %cst_25 : f32 to vector<16x128xf32>
    %84 = arith.subf %83, %82 : vector<16x128xf32>
    %85 = arith.mulf %81, %84 : vector<16x128xf32>
    %86 = arith.mulf %36, %85 : vector<16x128xf32>
    %87 = arith.subf %74, %86 : vector<16x128xf32>
    %cst_26 = arith.constant 1.000000e+00 : f32
    %88 = vector.broadcast %cst_26 : f32 to vector<16x128xf32>
    %89 = arith.subf %0, %88 : vector<16x128xf32>
    %90 = arith.mulf %89, %87 : vector<16x128xf32>
    %91 = arith.subf %90, %76 : vector<16x128xf32>
    %cst_27 = arith.constant 0.000000e+00 : f32
    %92 = vector.broadcast %cst_27 : f32 to vector<16x128xf32>
    %93 = arith.select %11, %91, %92 : vector<16x128xi1>, vector<16x128xf32>
    %cst_28 = arith.constant dense<0.000000e+00> : vector<128xf32>
    %94 = vector.multi_reduction <add>, %93, %cst_28 [0] : vector<16x128xf32> to vector<128xf32>
    %95 = vector.shape_cast %94 : vector<128xf32> to vector<1x128xf32>
    %cst_29 = arith.constant 0.000000e+00 : f32
    %96 = vector.broadcast %cst_29 : f32 to vector<16x128xf32>
    %97 = arith.select %11, %89, %96 : vector<16x128xi1>, vector<16x128xf32>
    %cst_30 = arith.constant dense<0.000000e+00> : vector<128xf32>
    %98 = vector.multi_reduction <add>, %97, %cst_30 [0] : vector<16x128xf32> to vector<128xf32>
    %99 = vector.shape_cast %98 : vector<128xf32> to vector<1x128xf32>
    %100 = vector.shape_cast %95 : vector<1x128xf32> to vector<1x1x128xf32>
    %c0_31 = arith.constant 0 : index
    %c0_32 = arith.constant 0 : index
    %c0_33 = arith.constant 0 : index
    %101 = vector.load %arg4[%c0_31, %c0_32, %c0_33] : memref<1x2x128xf32, #tpu.memory_space<vmem>>, vector<1x1x128xf32>
    tpu.vector_store %arg4[%c0_31, %c0_32, %c0_33], %100 {strides = array<i32>} : memref<1x2x128xf32, #tpu.memory_space<vmem>>, vector<1x1x128xf32>,
    %102 = vector.shape_cast %99 : vector<1x128xf32> to vector<1x1x128xf32>
    %c0_34 = arith.constant 0 : index
    %c1 = arith.constant 1 : index
    %c0_35 = arith.constant 0 : index
    %103 = vector.load %arg4[%c0_34, %c1, %c0_35] : memref<1x2x128xf32, #tpu.memory_space<vmem>>, vector<1x1x128xf32>
    tpu.vector_store %arg4[%c0_34, %c1, %c0_35], %102 {strides = array<i32>} : memref<1x2x128xf32, #tpu.memory_space<vmem>>, vector<1x1x128xf32>,
    %c0_36 = arith.constant 0 : index
    %c0_37 = arith.constant 0 : index
    %104 = vector.load %arg3[%c0_36, %c0_37] : memref<16x128xf32, #tpu.memory_space<vmem>>, vector<16x128xf32>
    %cst_38 = arith.constant dense<0.000000e+00> : vector<16x16xf32>
    %105 = tpu.matmul %104, %0, %cst_38 {dimension_numbers = #tpu.dot_dimension_numbers<[1], [1], [0], [0], [0, 0, 1, 0], [], []>} : vector<16x128xf32>, vector<16x128xf32>, vector<16x16xf32> -> vector<16x16xf32>
    %106 = math.log %105 : vector<16x16xf32>
    %107 = tpu.reciprocal %105 {approx = true} : vector<16x16xf32> -> vector<16x16xf32>
    %108 = arith.mulf %105, %107 : vector<16x16xf32>
    %cst_39 = arith.constant 2.000000e+00 : f32
    %109 = vector.broadcast %cst_39 : f32 to vector<16x16xf32>
    %110 = arith.subf %109, %108 : vector<16x16xf32>
    %111 = arith.mulf %107, %110 : vector<16x16xf32>
    %112 = arith.mulf %105, %111 : vector<16x16xf32>
    %cst_40 = arith.constant 2.000000e+00 : f32
    %113 = vector.broadcast %cst_40 : f32 to vector<16x16xf32>
    %114 = arith.subf %113, %112 : vector<16x16xf32>
    %115 = arith.mulf %111, %114 : vector<16x16xf32>
    %116 = arith.mulf %115, %115 : vector<16x16xf32>
    %cst_41 = arith.constant 5.000000e-01 : f32
    %117 = vector.broadcast %cst_41 : f32 to vector<16x16xf32>
    %118 = arith.subf %105, %117 : vector<16x16xf32>
    %119 = arith.mulf %118, %106 : vector<16x16xf32>
    %120 = arith.subf %119, %105 : vector<16x16xf32>
    %cst_42 = arith.constant 0.918938517 : f32
    %121 = vector.broadcast %cst_42 : f32 to vector<16x16xf32>
    %122 = arith.addf %120, %121 : vector<16x16xf32>
    %cst_43 = arith.constant 7.93650805E-4 : f32
    %123 = vector.broadcast %cst_43 : f32 to vector<16x16xf32>
    %124 = arith.mulf %116, %123 : vector<16x16xf32>
    %cst_44 = arith.constant 0.00277777785 : f32
    %125 = vector.broadcast %cst_44 : f32 to vector<16x16xf32>
    %126 = arith.subf %125, %124 : vector<16x16xf32>
    %127 = arith.mulf %116, %126 : vector<16x16xf32>
    %cst_45 = arith.constant 0.0833333358 : f32
    %128 = vector.broadcast %cst_45 : f32 to vector<16x16xf32>
    %129 = arith.subf %128, %127 : vector<16x16xf32>
    %130 = arith.mulf %115, %129 : vector<16x16xf32>
    %131 = arith.addf %122, %130 : vector<16x16xf32>
    %cst_46 = arith.constant 5.000000e-01 : f32
    %132 = vector.broadcast %cst_46 : f32 to vector<16x16xf32>
    %133 = arith.mulf %132, %115 : vector<16x16xf32>
    %134 = arith.subf %106, %133 : vector<16x16xf32>
    %cst_47 = arith.constant 0.0039682542 : f32
    %135 = vector.broadcast %cst_47 : f32 to vector<16x16xf32>
    %136 = arith.mulf %116, %135 : vector<16x16xf32>
    %cst_48 = arith.constant 0.00833333377 : f32
    %137 = vector.broadcast %cst_48 : f32 to vector<16x16xf32>
    %138 = arith.subf %137, %136 : vector<16x16xf32>
    %139 = arith.mulf %116, %138 : vector<16x16xf32>
    %cst_49 = arith.constant 0.0833333358 : f32
    %140 = vector.broadcast %cst_49 : f32 to vector<16x16xf32>
    %141 = arith.subf %140, %139 : vector<16x16xf32>
    %142 = arith.mulf %116, %141 : vector<16x16xf32>
    %143 = arith.subf %134, %142 : vector<16x16xf32>
    %144 = tpu.iota {dimensions = array<i32: 1>} : vector<16x16xi32>
    %145 = tpu.iota {dimensions = array<i32: 0>} : vector<16x16xi32>
    %c16_i32_50 = arith.constant 16 : i32
    %146 = arith.muli %arg0, %c16_i32_50 : i32
    %147 = vector.broadcast %146 : i32 to vector<16x16xi32>
    %148 = arith.addi %147, %144 : vector<16x16xi32>
    %c16_i32_51 = arith.constant 16 : i32
    %149 = vector.broadcast %c16_i32_51 : i32 to vector<16x16xi32>
    %150 = arith.muli %148, %149 : vector<16x16xi32>
    %151 = arith.addi %150, %145 : vector<16x16xi32>
    %c256_i32_52 = arith.constant 256 : i32
    %152 = vector.broadcast %c256_i32_52 : i32 to vector<16x16xi32>
    %153 = arith.cmpi slt, %151, %152 : vector<16x16xi32>
    %cst_53 = arith.constant 0.000000e+00 : f32
    %154 = vector.broadcast %cst_53 : f32 to vector<16x16xf32>
    %155 = arith.select %153, %131, %154 : vector<16x16xi1>, vector<16x16xf32>
    %cst_54 = arith.constant dense<0.000000e+00> : vector<16xf32>
    %156 = vector.multi_reduction <add>, %155, %cst_54 [0] : vector<16x16xf32> to vector<16xf32>
    %157 = vector.shape_cast %156 : vector<16xf32> to vector<1x16xf32>
    %158 = vector.shape_cast %157 : vector<1x16xf32> to vector<1x1x16xf32>
    %c0_55 = arith.constant 0 : index
    %c0_56 = arith.constant 0 : index
    %c0_57 = arith.constant 0 : index
    %159 = vector.load %arg5[%c0_55, %c0_56, %c0_57] : memref<1x2x16xf32, #tpu.memory_space<vmem>>, vector<1x1x16xf32>
    tpu.vector_store %arg5[%c0_55, %c0_56, %c0_57], %158 {strides = array<i32>} : memref<1x2x16xf32, #tpu.memory_space<vmem>>, vector<1x1x16xf32>,
    %cst_58 = arith.constant 0.000000e+00 : f32
    %160 = vector.broadcast %cst_58 : f32 to vector<16x16xf32>
    %161 = arith.select %153, %143, %160 : vector<16x16xi1>, vector<16x16xf32>
    %cst_59 = arith.constant dense<0.000000e+00> : vector<16xf32>
    %162 = vector.multi_reduction <add>, %161, %cst_59 [0] : vector<16x16xf32> to vector<16xf32>
    %163 = vector.shape_cast %162 : vector<16xf32> to vector<1x16xf32>
    %164 = vector.shape_cast %163 : vector<1x16xf32> to vector<1x1x16xf32>
    %c0_60 = arith.constant 0 : index
    %c1_61 = arith.constant 1 : index
    %c0_62 = arith.constant 0 : index
    %165 = vector.load %arg5[%c0_60, %c1_61, %c0_62] : memref<1x2x16xf32, #tpu.memory_space<vmem>>, vector<1x1x16xf32>
    tpu.vector_store %arg5[%c0_60, %c1_61, %c0_62], %164 {strides = array<i32>} : memref<1x2x16xf32, #tpu.memory_space<vmem>>, vector<1x1x16xf32>,
    return
  }
  func.func @transform_0(%arg0: i32) -> (i32, i32) {
    %c0_i32 = arith.constant 0 : i32
    %c0_i32_0 = arith.constant 0 : i32
    return %arg0, %c0_i32 : i32, i32
  }
  func.func @transform_1(%arg0: i32) -> (i32, i32) {
    %c0_i32 = arith.constant 0 : i32
    %c0_i32_0 = arith.constant 0 : i32
    %c0_i32_1 = arith.constant 0 : i32
    return %c0_i32, %c0_i32_0 : i32, i32
  }
  func.func @transform_2(%arg0: i32) -> (i32, i32) {
    %c0_i32 = arith.constant 0 : i32
    %c0_i32_0 = arith.constant 0 : i32
    %c0_i32_1 = arith.constant 0 : i32
    return %c0_i32, %c0_i32_0 : i32, i32
  }
  func.func @transform_3(%arg0: i32) -> (i32, i32, i32) {
    %c0_i32 = arith.constant 0 : i32
    %c0_i32_0 = arith.constant 0 : i32
    %c0_i32_1 = arith.constant 0 : i32
    return %arg0, %c0_i32, %c0_i32_0 : i32, i32, i32
  }
  func.func @transform_4(%arg0: i32) -> (i32, i32, i32) {
    %c0_i32 = arith.constant 0 : i32
    %c0_i32_0 = arith.constant 0 : i32
    %c0_i32_1 = arith.constant 0 : i32
    return %arg0, %c0_i32, %c0_i32_0 : i32, i32, i32
  }
}

</mosaic_0001>

<bundles_post_ra>
// kernel: eq.22
= control target key start
LH: loop header
LB: loop body
LE: loop exit
PB: predicated region body
PF: predicated region fallthrough
CT: control target
= control target key end

     0   :  { %s131_s10 = smov 120   ;;  %s132_s11 = smov 104   ;;  %vm3_vm0 = vcmask 64512   ;;  %vm9_vm1 = vcmask 1048512   ;;  %vm15_vm2 = vcmask 982912   ;;  %vm21_vm3 = vcmask 917312   ;;  %s207_s0 = inlined_call_operand.vmem [shape: s32[16,8], index: 0, kind: input, shape index: {}]   ;;  %s208_s1 = inlined_call_operand.vmem [shape: s32[128], index: 1, kind: output, shape index: {}]  }
   0x1   :  { %v101_v0 = vld [vmem:[%s207_s0 + $0xf] sm:$0x1]   ;;  %v103_v1 = vld [vmem:[%s207_s0 + $0xd] sm:$0x1]   ;;  %v102_v2 = vld [vmem:[%s207_s0 + $0xe] sm:$0x1]  }
   0x2   :  { %7 = vrot.lane.b32.xlu0 %v101_v0, %s131_s10  ;;  %19 = vrot.lane.b32.xlu1 %v103_v1, %s132_s11  ;;  %v104_v3 = vld [vmem:[%s207_s0 + $0xc] sm:$0x1]   ;;  %s133_s16 = smov 112   ;;  %s134_s17 = smov 96   ;;  %v105_v4 = vld [vmem:[%s207_s0 + $0xb] sm:$0x1]  }
   0x3   :  { %v106_v5 = vld [vmem:[%s207_s0 + $0xa] sm:$0x1]   ;;  %v2_v6 = vld [vmem:[%s207_s0] sm:$0x1]   ;;  %s135_s24 = smov 88   ;;  %s136_s25 = smov 80  }
   0x4   :  { %4 = vst.msk [vmem:[#allocation0] sm:$0x1] %vm3_vm0, %v2_v6   ;;  %v107_v7 = vld [vmem:[%s207_s0 + $0x9] sm:$0x1]   ;;  %v108_v8 = vld [vmem:[%s207_s0 + $0x8] sm:$0x1]  }
   0x5   :  { %s137_s30 = smov 72   ;;  %s138_s2 = smov 64   ;;  %v109_v9 = vld [vmem:[%s207_s0 + $0x7] sm:$0x1]   ;;  %v110_v10 = vld [vmem:[%s207_s0 + $0x6] sm:$0x1]  }
   0x6   :  { %13 = vrot.lane.b32.xlu0 %v102_v2, %s133_s16  ;;  %25 = vrot.lane.b32.xlu1 %v104_v3, %s134_s17  ;;  %s139_s7 = smov 56   ;;  %s140_s8 = smov 48   ;;  %v111_v11 = vld [vmem:[%s207_s0 + $0x5] sm:$0x1]   ;;  %v112_v12 = vld [vmem:[%s207_s0 + $0x4] sm:$0x1]  }
   0x7   :  { %s141_s13 = smov 40   ;;  %s142_s14 = smov 32   ;;  %v113_v13 = vld [vmem:[%s207_s0 + $0x3] sm:$0x1]   ;;  %v114_v14 = vld [vmem:[%s207_s0 + $0x2] sm:$0x1]  }
   0x8   :  { %s143_s19 = smov 24   ;;  %s144_s20 = smov 16   ;;  %v115_v15 = vld [vmem:[%s207_s0 + $0x1] sm:$0x1]   ;;  %vm27_vm4 = vcmask 851712   ;;  %vm33_vm5 = vcmask 786112  }
   0x9   :  { %s145_s0 = smov 8   ;;  %vm39_vm6 = vcmask 720512   ;;  %vm45_vm7 = vcmask 654912   ;;  %vm51_vm8 = vcmask 589312   ;;  %vm57_vm9 = vcmask 523712  }
   0xa   :  { %31 = vrot.lane.b32.xlu0 %v105_v4, %s135_s24  ;;  %37 = vrot.lane.b32.xlu1 %v106_v5, %s136_s25  ;;  %vm63_vm10 = vcmask 458112   ;;  %vm69_vm11 = vcmask 392512   ;;  %vm75_vm12 = vcmask 326912   ;;  %vm81_vm13 = vcmask 261312  }
   0xb   :  { %vm87_vm14 = vcmask 195712   ;;  %vm93_vm15 = vcmask 130112  }
   0xe   :  { %43 = vrot.lane.b32.xlu0 %v107_v7, %s137_s30  ;;  %49 = vrot.lane.b32.xlu1 %v108_v8, %s138_s2 }
  0x12   :  { %55 = vrot.lane.b32.xlu0 %v109_v9, %s139_s7  ;;  %61 = vrot.lane.b32.xlu1 %v110_v10, %s140_s8 }
  0x16   :  { %67 = vrot.lane.b32.xlu0 %v111_v11, %s141_s13  ;;  %73 = vrot.lane.b32.xlu1 %v112_v12, %s142_s14 }
  0x1a   :  { %79 = vrot.lane.b32.xlu0 %v113_v13, %s143_s19  ;;  %85 = vrot.lane.b32.xlu1 %v114_v14, %s144_s20 }
  0x1e   :  { %91 = vrot.lane.b32.xlu0 %v115_v15, %s145_s0 }
  0x74   :  { %v8_v16 = vpop.permute.xlu0 %7   ;;  %v20_v17 = vpop.permute.xlu1 %19  }
  0x75   :  { %10 = vst.msk [vmem:[#allocation0] sm:$0x1] %vm9_vm1, %v8_v16  }
  0x78   :  { %v14_v18 = vpop.permute.xlu0 %13   ;;  %v26_v19 = vpop.permute.xlu1 %25  }
  0x79   :  { %16 = vst.msk [vmem:[#allocation0] sm:$0x1] %vm15_vm2, %v14_v18  }
  0x7a   :  { %22 = vst.msk [vmem:[#allocation0] sm:$0x1] %vm21_vm3, %v20_v17  }
  0x7b   :  { %28 = vst.msk [vmem:[#allocation0] sm:$0x1] %vm27_vm4, %v26_v19  }
  0x7c   :  { %v32_v20 = vpop.permute.xlu0 %31   ;;  %v38_v21 = vpop.permute.xlu1 %37  }
  0x7d   :  { %34 = vst.msk [vmem:[#allocation0] sm:$0x1] %vm33_vm5, %v32_v20  }
  0x7e   :  { %40 = vst.msk [vmem:[#allocation0] sm:$0x1] %vm39_vm6, %v38_v21  }
  0x80   :  { %v44_v22 = vpop.permute.xlu0 %43   ;;  %v50_v23 = vpop.permute.xlu1 %49  }
  0x81   :  { %46 = vst.msk [vmem:[#allocation0] sm:$0x1] %vm45_vm7, %v44_v22  }
  0x82   :  { %52 = vst.msk [vmem:[#allocation0] sm:$0x1] %vm51_vm8, %v50_v23  }
  0x84   :  { %v56_v24 = vpop.permute.xlu0 %55   ;;  %v62_v25 = vpop.permute.xlu1 %61  }
  0x85   :  { %58 = vst.msk [vmem:[#allocation0] sm:$0x1] %vm57_vm9, %v56_v24  }
  0x86   :  { %64 = vst.msk [vmem:[#allocation0] sm:$0x1] %vm63_vm10, %v62_v25  }
  0x88   :  { %v68_v26 = vpop.permute.xlu0 %67   ;;  %v74_v27 = vpop.permute.xlu1 %73  }
  0x89   :  { %70 = vst.msk [vmem:[#allocation0] sm:$0x1] %vm69_vm11, %v68_v26  }
  0x8a   :  { %76 = vst.msk [vmem:[#allocation0] sm:$0x1] %vm75_vm12, %v74_v27  }
  0x8c   :  { %v80_v28 = vpop.permute.xlu0 %79   ;;  %v86_v29 = vpop.permute.xlu1 %85  }
  0x8d   :  { %82 = vst.msk [vmem:[#allocation0] sm:$0x1] %vm81_vm13, %v80_v28  }
  0x8e   :  { %88 = vst.msk [vmem:[#allocation0] sm:$0x1] %vm87_vm14, %v86_v29  }
  0x90   :  { %v92_v30 = vpop.permute.xlu0 %91  }
  0x91   :  { %94 = vst.msk [vmem:[#allocation0] sm:$0x1] %vm93_vm15, %v92_v30  }
  0x98   :  { %v98_v31 = vld [vmem:[#allocation0] sm:$0x1] }
  0x99   :  { %100 = vst [vmem:[%s208_s1] sm:$0x1] %v98_v31 }

// kernel: edl_kldiv_loss.1
= control target key start
LH: loop header
LB: loop body
LE: loop exit
PB: predicated region body
PF: predicated region fallthrough
CT: control target
= control target key end

     0   :  { %v18_v0 = vlaneseq  ;;  %vm313_vm3 = vcmask 130048   ;;  %vm323_vm5 = vcmask 122880   ;;  %s534_s0 = inlined_call_operand.vmem [shape: f32[16,128], index: 0, kind: input, shape index: {}]   ;;  %s535_s2 = inlined_call_operand.vmem [shape: f32[16,128], index: 2, kind: input, shape index: {}]   ;;  %s536_s1 = inlined_call_operand.vmem [shape: s32[1,128], index: 1, kind: input, shape index: {}]   ;;  %s537_s3 = inlined_call_operand.vmem [shape: f32[1,2,128], index: 3, kind: output, shape index: {0}]   ;;  %s538_s4 = inlined_call_operand.vmem [shape: f32[1,2,16], index: 4, kind: output, shape index: {1}]  }
   0x1   :  { %v419_v1 = vld [vmem:[%s534_s0] sm:$0xff]  ;;  %v424_v2 = vld [vmem:[%s534_s0 + $0x8] sm:$0xff] }
   0x2   :  { %v170_v3 = vld [vmem:[%s535_s2] sm:$0xff]  ;;  %v363_v4 = vpack.c.bf16 %v424_v2, %v419_v1  ;;  %v432_v5 = vshrl.u32 %v18_v0, 7  ;;  %v38_v7 = vadd.f32 6.0, %v419_v1  ;;  %v39_v8 = vadd.f32 6.0, %v424_v2  ;;  %v171_v20 = vld [vmem:[%s535_s2 + $0x8] sm:$0xff] }
   0x3   :  { %360 = vmatprep.mubr.f32.mxu0 %v170_v3  ;;  %v345_v6 = vld [vmem:[%s536_s1] ss:$0 sm:$0xff]  ;;  %v440_v9 = vadd.f32 4.0, %v419_v1  ;;  %v449_v14 = vadd.f32 4.0, %v424_v2  ;;  %v464_v23 = vadd.f32 -1.0, %v419_v1  ;;  %v469_v24 = vadd.f32 -1.0, %v424_v2 }
   0x4   :  { %364 = vmatprep.subr.bf16.mxu0 %v363_v4  ;;  %v443_v10 = vadd.s32 8, %v432_v5  ;;  %v25_v11 = vmul.u32 16, %v432_v5  ;;  %v40_v12 = vmul.f32 %v38_v7, %v419_v1  ;;  %v41_v13 = vmul.f32 %v39_v8, %v424_v2 }
   0x5   :  { %366 = vmatpush3.bf16.xpose.msra.mxu0 %v363_v4  ;;  %367 = vrcp.f32 %v440_v9  ;;  %v52_v28 = vmul.f32 4.0, %v419_v1  ;;  %v53_v33 = vmul.f32 4.0, %v424_v2  ;;  %v346_v56 = vadd.f32 -0.5, %v440_v9 }
   0x6   :  { %v26_v15 = vmul.u32 16, %v443_v10  ;;  %v452_v16 = vadd.s32 %v345_v6, %v25_v11  ;;  %v42_v17 = vadd.f32 11.0, %v40_v12  ;;  %v43_v18 = vadd.f32 11.0, %v41_v13 }
   0x7   :  { %369 = vrcp.f32 %v449_v14  ;;  %v54_v34 = vadd.f32 18.0, %v52_v28  ;;  %v55_v40 = vadd.f32 18.0, %v53_v33  ;;  %v347_v62 = vadd.f32 -0.5, %v449_v14 }
   0x8   :  { %v454_v19 = vadd.s32 %v345_v6, %v26_v15  ;;  %vm34_vm0 = vcmp.lt.s32.totalorder %v452_v16, 256  ;;  %v44_v21 = vmul.f32 %v42_v17, %v419_v1  ;;  %v45_v22 = vmul.f32 %v43_v18, %v424_v2 }
   0x9   :  { %v159_v27 = vsel %vm34_vm0, %v464_v23, 0.0  ;;  %371 = vlog2.f32 %v440_v9  ;;  %v56_v41 = vmul.f32 %v54_v34, %v419_v1  ;;  %v57_v50 = vmul.f32 %v55_v40, %v424_v2 }
   0xa   :  { %vm35_vm1 = vcmp.lt.s32.totalorder %v454_v19, 256  ;;  %v46_v25 = vadd.f32 6.0, %v44_v21  ;;  %v47_v26 = vadd.f32 6.0, %v45_v22  ;;  %373 = vlog2.f32 %v449_v14 }
   0xb   :  { %v160_v29 = vsel %vm35_vm1, %v469_v24, 0.0  ;;  %v58_v51 = vadd.f32 22.0, %v56_v41  ;;  %v59_v3 = vadd.f32 22.0, %v57_v50 }
   0xc   :  { %361 = vmatmul.mubr.f32.vlgmr.msra.gmra.mrb[0].mxu0 %v171_v20  ;;  %v48_v30 = vmul.f32 %v46_v25, %v419_v1  ;;  %v481_v31 = vmul.f32 %v47_v26, %v424_v2  ;;  %v161_v32 = vadd.f32 %v160_v29, %v159_v27 }
   0xd   :  { %v60_v4 = vmul.f32 %v58_v51, %v419_v1  ;;  %v61_v21 = vmul.f32 %v59_v3, %v424_v2 }
   0xe   :  { %v162_v35 = vrot.slane %v161_v32, 4  ;;  %375 = vrcp.f32 %v48_v30 }
   0xf   :  { %v368_v36 = vpop.eup %367  ;;  %377 = vrcp.f32 %v481_v31  ;;  %v62_v22 = vadd.f32 6.0, %v60_v4 }
  0x10   :  { %v163_v37 = vadd.f32 %v162_v35, %v161_v32  ;;  %v70_v38 = vmul.f32 %v368_v36, %v440_v9  ;;  %379 = vlog2.f32 %v48_v30 }
  0x11   :  { %v370_v39 = vpop.eup %369  ;;  %381 = vlog2.f32 %v481_v31 }
  0x12   :  { %v164_v42 = vrot.slane %v163_v37, 2  ;;  %v71_v43 = vmul.f32 %v370_v39, %v449_v14  ;;  %v72_v44 = vsub.f32 2.0, %v70_v38 }
  0x13   :  { %v372_v46 = vpop.eup %371 }
  0x14   :  { %v165_v45 = vadd.f32 %v164_v42, %v163_v37  ;;  %v73_v47 = vsub.f32 2.0, %v71_v43  ;;  %v74_v48 = vmul.f32 %v368_v36, %v72_v44  ;;  %v374_v49 = vpop.eup %373  ;;  %v491_v55 = vmul.f32 0.6931472, %v372_v46 }
  0x15   :  { %v494_v59 = vmul.f32 0.6931472, %v374_v49 }
  0x16   :  { %v166_v52 = vrot.slane %v165_v45, 1  ;;  %v75_v53 = vmul.f32 %v370_v39, %v73_v47  ;;  %v76_v54 = vmul.f32 %v74_v48, %v440_v9  ;;  %v86_v12 = vmul.f32 %v346_v56, %v491_v55 }
  0x17   :  { %v87_v18 = vmul.f32 %v347_v62, %v494_v59 }
  0x18   :  { %v167_v57 = vadd.f32 %v166_v52, %v165_v45  ;;  %v376_v58 = vpop.eup %375  ;;  %v77_v60 = vmul.f32 %v75_v53, %v449_v14  ;;  %v78_v61 = vsub.f32 2.0, %v76_v54  ;;  %v88_v27 = vsub.f32 %v86_v12, %v440_v9 }
  0x19   :  { %v378_v63 = vpop.eup %377  ;;  %v128_v6 = vmul.f32 %v376_v58, %v48_v30  ;;  %v89_v33 = vsub.f32 %v87_v18, %v449_v14  ;;  %v63_v45 = vadd.f32 6.0, %v61_v21 }
  0x1a   :  { %169 = vst [vmem:[%s537_s3 + $0x1] sm:$0x1] %v167_v57  ;;  %v79_v7 = vsub.f32 2.0, %v77_v60  ;;  %v80_v8 = vmul.f32 %v78_v61, %v74_v48  ;;  %v129_v11 = vmul.f32 %v378_v63, %v481_v31  ;;  %v380_v44 = vpop.eup %379  ;;  %v90_v48 = vadd.f32 0.9189385, %v88_v27 }
  0x1b   :  { %v130_v13 = vsub.f32 2.0, %v128_v6  ;;  %v91_v51 = vadd.f32 0.9189385, %v89_v33  ;;  %v121_v61 = vmul.f32 0.6931472, %v380_v44 }
  0x1c   :  { %v81_v15 = vmul.f32 %v79_v7, %v75_v53  ;;  %v82_v17 = vmul.f32 %v80_v8, %v80_v8  ;;  %v131_v1 = vsub.f32 2.0, %v129_v11  ;;  %v104_v37 = vmul.f32 0.5, %v80_v8 }
  0x1d   :  { %v132_v20 = vmul.f32 %v376_v58, %v130_v13 }
  0x1e   :  { %v83_v25 = vmul.f32 %v81_v15, %v81_v15  ;;  %v92_v26 = vmul.f32 0.0007936508, %v82_v17  ;;  %v108_v28 = vmul.f32 0.003968254, %v82_v17  ;;  %v133_v29 = vmul.f32 %v378_v63, %v131_v1 }
  0x1f   :  { %v134_v32 = vmul.f32 %v132_v20, %v48_v30  ;;  %v105_v42 = vmul.f32 0.5, %v81_v15  ;;  %v382_v30 = vpop.eup %381  ;;  %v106_v52 = vsub.f32 %v491_v55, %v104_v37 }
  0x20   :  { %v93_v34 = vmul.f32 0.0007936508, %v83_v25  ;;  %v94_v35 = vsub.f32 0.0027777778, %v92_v26  ;;  %v109_v36 = vmul.f32 0.003968254, %v83_v25  ;;  %v135_v39 = vmul.f32 %v133_v29, %v481_v31 }
  0x21   :  { %v110_v38 = vsub.f32 0.008333334, %v108_v28  ;;  %v136_v40 = vsub.f32 2.0, %v134_v32  ;;  %v107_v57 = vsub.f32 %v494_v59, %v105_v42  ;;  %v123_v62 = vmul.f32 0.6931472, %v382_v30 }
  0x22   :  { %v95_v41 = vsub.f32 0.0027777778, %v93_v34  ;;  %v96_v2 = vmul.f32 %v94_v35, %v82_v17  ;;  %v111_v43 = vsub.f32 0.008333334, %v109_v36  ;;  %v137_v46 = vsub.f32 2.0, %v135_v39 }
  0x23   :  { %v112_v9 = vmul.f32 %v110_v38, %v82_v17  ;;  %v138_v47 = vmul.f32 %v136_v40, %v132_v20 }
  0x24   :  { %v97_v14 = vmul.f32 %v95_v41, %v83_v25  ;;  %v98_v49 = vsub.f32 0.083333336, %v96_v2  ;;  %v113_v50 = vmul.f32 %v111_v43, %v83_v25  ;;  %v139_v31 = vmul.f32 %v137_v46, %v133_v29 }
  0x25   :  { %v114_v53 = vsub.f32 0.083333336, %v112_v9  ;;  %v140_v63 = vmul.f32 %v138_v47, %v62_v22  ;;  %v304_v47 = vand.u32 127, %v18_v0 }
  0x26   :  { %v99_v54 = vsub.f32 0.083333336, %v97_v14  ;;  %v100_v56 = vmul.f32 %v98_v49, %v80_v8  ;;  %v115_v58 = vsub.f32 0.083333336, %v113_v50  ;;  %v141_v7 = vmul.f32 %v139_v31, %v63_v45 }
  0x27   :  { %v116_v60 = vmul.f32 %v114_v53, %v82_v17  ;;  %v306_v31 = vmul.u32 16, %v304_v47 }
  0x28   :  { %v101_v3 = vmul.f32 %v99_v54, %v81_v15  ;;  %v102_v4 = vadd.f32 %v100_v56, %v90_v48  ;;  %v117_v6 = vmul.f32 %v115_v58, %v83_v25 }
  0x29   :  { %v118_v11 = vsub.f32 %v106_v52, %v116_v60  ;;  %v308_v0 = vadd.s32 %v306_v31, %v443_v10 }
  0x2a   :  { %v103_v12 = vadd.f32 %v101_v3, %v91_v51  ;;  %v119_v13 = vsub.f32 %v107_v57, %v117_v6  ;;  %v124_v18 = vsub.f32 %v102_v4, %v121_v61 }
  0x2b   :  { %v142_v55 = vsub.f32 %v118_v11, %v140_v63  ;;  %vm310_vm2 = vcmp.lt.s32.totalorder %v308_v0, 256 }
  0x2c   :  { %v125_v1 = vsub.f32 %v103_v12, %v123_v62  ;;  %v143_v20 = vsub.f32 %v119_v13, %v141_v7 }
  0x2d   :  { %v146_v8 = vmul.f32 %v464_v23, %v142_v55 }
  0x2e   :  { %v147_v59 = vmul.f32 %v469_v24, %v143_v20  ;;  %v307_v20 = vadd.s32 %v306_v31, %v432_v5 }
  0x2f   :  { %v148_v21 = vsub.f32 %v146_v8, %v124_v18 }
  0x30   :  { %v149_v17 = vsub.f32 %v147_v59, %v125_v1  ;;  %vm309_vm4 = vcmp.lt.s32.totalorder %v307_v20, 256 }
  0x31   :  { %v150_v22 = vsel %vm34_vm0, %v148_v21, 0.0 }
  0x32   :  { %v151_v15 = vsel %vm35_vm1, %v149_v17, 0.0 }
  0x33   :  { %v152_v25 = vadd.f32 %v151_v15, %v150_v22 }
  0x35   :  { %v153_v26 = vrot.slane %v152_v25, 4 }
  0x37   :  { %v154_v27 = vadd.f32 %v153_v26, %v152_v25 }
  0x39   :  { %v155_v28 = vrot.slane %v154_v27, 2 }
  0x3b   :  { %v156_v29 = vadd.f32 %v155_v28, %v154_v27 }
  0x3d   :  { %v157_v32 = vrot.slane %v156_v29, 1 }
  0x3f   :  { %v158_v33 = vadd.f32 %v157_v32, %v156_v29 }
  0x41   :  { %168 = vst [vmem:[%s537_s3] sm:$0x1] %v158_v33 }
  0xdf   :  { %v362_v23 = vpop.f32.mrb[0].mxu0 }
  0xe0   :  { %v238_v24 = vpop.f32.mrb[1].mxu0  ;;  %383 = vrcp.f32 %v362_v23  ;;  %v351_v46 = vadd.f32 -0.5, %v362_v23 }
  0xe1   :  { %385 = vrcp.f32 %v238_v24  ;;  %v350_v53 = vadd.f32 -0.5, %v238_v24 }
  0xe2   :  { %387 = vlog2.f32 %v362_v23 }
  0xe3   :  { %389 = vlog2.f32 %v238_v24 }
  0xea   :  { %v384_v16 = vpop.eup %383 }
  0xeb   :  { %v254_v19 = vmul.f32 %v384_v16, %v362_v23  ;;  %v386_v34 = vpop.eup %385 }
  0xec   :  { %v253_v36 = vmul.f32 %v386_v34, %v238_v24  ;;  %v388_v39 = vpop.eup %387 }
  0xed   :  { %v256_v35 = vsub.f32 2.0, %v254_v19  ;;  %v390_v43 = vpop.eup %389  ;;  %v250_v44 = vmul.f32 0.6931472, %v388_v39 }
  0xee   :  { %v255_v38 = vsub.f32 2.0, %v253_v36  ;;  %v248_v48 = vmul.f32 0.6931472, %v390_v43 }
  0xef   :  { %v258_v37 = vmul.f32 %v384_v16, %v256_v35  ;;  %v270_v49 = vmul.f32 %v351_v46, %v250_v44 }
  0xf0   :  { %v257_v41 = vmul.f32 %v386_v34, %v255_v38  ;;  %v269_v57 = vmul.f32 %v350_v53, %v248_v48 }
  0xf1   :  { %v260_v40 = vmul.f32 %v362_v23, %v258_v37  ;;  %v272_v60 = vsub.f32 %v270_v49, %v362_v23 }
  0xf2   :  { %v259_v42 = vmul.f32 %v257_v41, %v238_v24  ;;  %v271_v12 = vsub.f32 %v269_v57, %v238_v24 }
  0xf3   :  { %v262_v2 = vsub.f32 2.0, %v260_v40  ;;  %v274_v18 = vadd.f32 0.9189385, %v272_v60 }
  0xf4   :  { %v261_v9 = vsub.f32 2.0, %v259_v42  ;;  %v273_v10 = vadd.f32 0.9189385, %v271_v12 }
  0xf5   :  { %v264_v45 = vmul.f32 %v262_v2, %v258_v37 }
  0xf6   :  { %v263_v14 = vmul.f32 %v261_v9, %v257_v41 }
  0xf7   :  { %v266_v30 = vmul.f32 %v264_v45, %v264_v45  ;;  %v288_v63 = vmul.f32 0.5, %v264_v45 }
  0xf8   :  { %v265_v52 = vmul.f32 %v263_v14, %v263_v14  ;;  %v287_v55 = vmul.f32 0.5, %v263_v14 }
  0xf9   :  { %v276_v50 = vmul.f32 0.0007936508, %v266_v30  ;;  %v292_v51 = vmul.f32 0.003968254, %v266_v30  ;;  %v290_v59 = vsub.f32 %v250_v44, %v288_v63 }
  0xfa   :  { %v275_v58 = vmul.f32 0.0007936508, %v265_v52  ;;  %v291_v61 = vmul.f32 0.003968254, %v265_v52  ;;  %v289_v27 = vsub.f32 %v248_v48, %v287_v55 }
  0xfb   :  { %v278_v54 = vsub.f32 0.0027777778, %v276_v50  ;;  %v294_v56 = vsub.f32 0.008333334, %v292_v51 }
  0xfc   :  { %v277_v4 = vsub.f32 0.0027777778, %v275_v58  ;;  %v293_v6 = vsub.f32 0.008333334, %v291_v61 }
  0xfd   :  { %v280_v62 = vmul.f32 %v278_v54, %v266_v30  ;;  %v296_v3 = vmul.f32 %v294_v56, %v266_v30 }
  0xfe   :  { %v279_v13 = vmul.f32 %v277_v4, %v265_v52  ;;  %v295_v1 = vmul.f32 %v293_v6, %v265_v52 }
  0xff   :  { %v282_v7 = vsub.f32 0.083333336, %v280_v62  ;;  %v298_v11 = vsub.f32 0.083333336, %v296_v3 }
 0x100   :  { %v281_v17 = vsub.f32 0.083333336, %v279_v13  ;;  %v297_v22 = vsub.f32 0.083333336, %v295_v1 }
 0x101   :  { %v284_v8 = vmul.f32 %v282_v7, %v264_v45  ;;  %v300_v21 = vmul.f32 %v298_v11, %v266_v30 }
 0x102   :  { %v283_v26 = vmul.f32 %v281_v17, %v263_v14  ;;  %v299_v28 = vmul.f32 %v297_v22, %v265_v52 }
 0x103   :  { %v286_v15 = vadd.f32 %v284_v8, %v274_v18  ;;  %v302_v25 = vsub.f32 %v290_v59, %v300_v21 }
 0x104   :  { %v285_v33 = vadd.f32 %v283_v26, %v273_v10  ;;  %v301_v23 = vsub.f32 %v289_v27, %v299_v28 }
 0x105   :  { %v312_v29 = vsel %vm310_vm2, %v286_v15, 0.0  ;;  %v326_v32 = vsel %vm310_vm2, %v302_v25, 0.0 }
 0x106   :  { %v315_v5 = vsel %vm313_vm3, %v312_v29, 0.0  ;;  %v311_v24 = vsel %vm309_vm4, %v285_v33, 0.0  ;;  %v328_v16 = vsel %vm313_vm3, %v326_v32, 0.0  ;;  %v325_v34 = vsel %vm309_vm4, %v301_v23, 0.0 }
 0x107   :  { %v314_v19 = vsel %vm313_vm3, %v311_v24, 0.0  ;;  %v327_v36 = vsel %vm313_vm3, %v325_v34, 0.0 }
 0x108   :  { %v316_v35 = vadd.f32 %v315_v5, %v314_v19  ;;  %v329_v37 = vadd.f32 %v328_v16, %v327_v36 }
 0x10a   :  { %v317_v38 = vrot.slane %v316_v35, 4  ;;  %v330_v39 = vrot.slane %v329_v37, 4 }
 0x10c   :  { %v318_v40 = vadd.f32 %v317_v38, %v316_v35  ;;  %v331_v41 = vadd.f32 %v330_v39, %v329_v37 }
 0x10e   :  { %v319_v2 = vrot.slane %v318_v40, 2  ;;  %v332_v42 = vrot.slane %v331_v41, 2 }
 0x110   :  { %v320_v43 = vadd.f32 %v319_v2, %v318_v40  ;;  %v333_v44 = vadd.f32 %v332_v42, %v331_v41 }
 0x112   :  { %v321_v45 = vrot.slane %v320_v43, 1  ;;  %v334_v9 = vrot.slane %v333_v44, 1 }
 0x114   :  { %v322_v46 = vadd.f32 %v321_v45, %v320_v43  ;;  %v335_v47 = vadd.f32 %v334_v9, %v333_v44 }
 0x116   :  { %324 = vst.msk [vmem:[%s538_s4] sm:$0x1] %vm323_vm5, %v322_v46  ;;  %336 = vst.msk [vmem:[%s538_s4 + $0x1] sm:$0x1] %vm323_vm5, %v335_v47 }

</bundles_post_ra>
